<compile_context>
chip_gen: v5e
topology: v5e:2x2
jax: 0.10.0
libtpu: 0.0.40
codegen_flags: <defaults>
</compile_context>

<pallas_src>
import jax
import jax.numpy as jnp
from jax.experimental import pallas as pl
from jax.experimental.pallas import tpu as pltpu

_MIB = 1024 * 1024


def _round_up(x: int, m: int) -> int:
    return ((x + m - 1) // m) * m


def _cdiv(a: int, b: int) -> int:
    return (a + b - 1) // b


def _hw_config():
    """Per-generation tiling budget. v5e/v6e have 128 MiB VMEM, v7x only 64 MiB."""
    try:
        kind = jax.devices()[0].device_kind.lower()
    except Exception:  # pragma: no cover - defensive (e.g. interpret mode)
        kind = ""
    if "v5" in kind:
        # v5e: 4x128x128 MXU; explicit limit overrides the 16 MiB scoped default.
        return dict(tk_max=1024, budget=40 * _MIB, vmem_limit=64 * _MIB)
    if "v6" in kind or "trillium" in kind:
        # v6e: 2x256x256 MXU, most VMEM headroom -> biggest tiles.
        return dict(tk_max=2048, budget=64 * _MIB, vmem_limit=96 * _MIB)
    # v7x (64 MiB VMEM per TC) or unknown device: stay conservative.
    return dict(tk_max=1024, budget=24 * _MIB, vmem_limit=48 * _MIB)


def _footprint_bytes(tm: int, tn: int, tk: int) -> int:
    # Double-buffered x / weight / bias inputs + double-buffered f32 output.
    return 4 * 2 * (tm * tk + tk * tn + tn + tm * tn)


def _choose_tiles(B: int, N: int, K: int, cfg):
    tk_max = cfg["tk_max"]
    budget = cfg["budget"]

    # ---- M: small-batch fast path -> a single M tile with minimal row pad. ----
    b_pad = _round_up(B, 8)
    if b_pad <= 512:
        tm = b_pad                      # grid M == 1, e.g. B=300 -> tm=304
    else:
        gm = _cdiv(b_pad, 256)
        tm = _round_up(_cdiv(b_pad, gm), 8)
    Bp = _round_up(B, tm)
    m_tiles = Bp // tm

    # ---- K: one step if it fits; otherwise a 128-multiple tile that divides
    # round_up(K,128) so only the <=127-lane pad copy is materialized. ----
    k_pad = _round_up(K, 128)
    if k_pad <= tk_max:
        tk = k_pad
    else:
        units = k_pad // 128
        max_u = tk_max // 128
        div = next((u for u in range(max_u, 0, -1) if units % u == 0), 1)
        if div * 128 * 2 >= tk_max:     # exact divisor that is reasonably large
            tk = div * 128
        else:                           # fallback: near-max tile, accept pad
            gk = _cdiv(k_pad, tk_max)
            tk = _round_up(_cdiv(k_pad, gk), 128)
    Kp = _round_up(K, tk)

    # ---- N: minimize padded columns (wasted weight HBM traffic) under the
    # VMEM budget; prefer >=2 N tiles when the M grid is 1 (so both v7x
    # TensorCores get work), but only when that split is (nearly) free. ----
    n_pad = _round_up(N, 128)
    best_key, best_tn = None, 128
    gn = 1
    while True:
        tn = _round_up(_cdiv(n_pad, gn), 128)
        if _footprint_bytes(tm, tn, tk) <= budget:
            Np_c = _round_up(N, tn)
            waste = Np_c - N
            two_tc = (m_tiles > 1) or (Np_c // tn >= 2)
            key = (waste, 0 if (two_tc and gn <= 2) else 1, gn)
            if best_key is None or key < best_key:
                best_key, best_tn = key, tn
        if tn <= 128:
            break
        gn += 1
    tn = best_tn
    Np = _round_up(N, tn)

    return tm, tn, tk, Bp, Np, Kp


def _linear_kernel(x_ref, wt_ref, b_ref, o_ref):
    # x_ref: (tm, tk)   wt_ref: (tk, tn)   b_ref: (1, tn)   o_ref: (tm, tn) f32
    # The output block index is (i, j) for every k, so o_ref stays resident in
    # VMEM across the whole K reduction -> accumulate into it directly.
    k = pl.program_id(2)
    partial = jnp.dot(x_ref[...], wt_ref[...],
                      preferred_element_type=jnp.float32)

    @pl.when(k == 0)
    def _():
        o_ref[...] = partial

    @pl.when(k != 0)
    def _():
        o_ref[...] += partial

    @pl.when(k == pl.num_programs(2) - 1)
    def _():
        o_ref[...] += b_ref[...]        # bias added once, in the epilogue


def linear_forward(x, weight, bias, *, cast_to_bf16=False):
    """y = x @ weight.T + bias (PyTorch nn.Linear semantics), float32 output.

    `weight` keeps the PyTorch (out_features, in_features) layout at the call
    boundary; it is repacked once into a padded (K, N) slab so the kernel runs
    a plain (1,0)-contraction on the MXU.  For repeated inference, compute the
    repacked weight once and reuse it.
    """
    B, K = x.shape
    N, K2 = weight.shape
    assert K == K2, "input_dim mismatch"
    assert bias.shape == (N,), "bias shape mismatch"

    cfg = _hw_config()
    tm, tn, tk, Bp, Np, Kp = _choose_tiles(B, N, K, cfg)

    xp = x if (Bp == B and Kp == K) else jnp.pad(x, ((0, Bp - B), (0, Kp - K)))
    wt = weight.T                                   # (K, N) one-time repack
    wtp = wt if (Kp == K and Np == N) else jnp.pad(
        wt, ((0, Kp - K), (0, Np - N)))
    bp = (bias if Np == N else jnp.pad(bias, (0, Np - N))).reshape(1, Np)
    bp = bp.astype(jnp.float32)

    if cast_to_bf16:
        # Halves the dominant weight HBM stream; accumulation stays float32.
        xp = xp.astype(jnp.bfloat16)
        wtp = wtp.astype(jnp.bfloat16)

    grid = (Bp // tm, Np // tn, Kp // tk)

    out_padded = pl.pallas_call(
        _linear_kernel,
        out_shape=jax.ShapeDtypeStruct((Bp, Np), jnp.float32),
        grid_spec=pltpu.PrefetchScalarGridSpec(
            num_scalar_prefetch=0,
            grid=grid,
            in_specs=[
                pl.BlockSpec((tm, tk), lambda i, j, k: (i, k)),   # x tile
                # Weight (K, N) tile.  If xprof ever shows exposed DMA waits,
                # sweep pipeline_mode=pl.Buffered(3) on this spec only.
                pl.BlockSpec((tk, tn), lambda i, j, k: (k, j)),
                pl.BlockSpec((1, tn), lambda i, j, k: (0, j)),    # bias tile
            ],
            out_specs=pl.BlockSpec((tm, tn), lambda i, j, k: (i, j)),
        ),
        compiler_params=pltpu.CompilerParams(
            # M/N parallel (megacore / 2-TC sharding on v7x), K reduction last.
            dimension_semantics=("parallel", "parallel", "arbitrary"),
            vmem_limit_bytes=cfg["vmem_limit"],
        ),
    )(xp, wtp, bp)

    if Bp == B and Np == N:
        return out_padded
    return out_padded[:B, :N]


if __name__ == "__main__":
    # Shapes implied by the module: input_dim=32, output_dim=8, batch=4.
    batch, input_dim, output_dim = 4, 32, 8

    key = jax.random.PRNGKey(0)
    kx, kw, kb = jax.random.split(key, 3)

    x = jax.random.normal(kx, (batch, input_dim), dtype=jnp.float32)
    # Deterministic parameter init (mimicking nn.Linear's uniform init range).
    bound = 1.0 / (input_dim ** 0.5)
    weight = jax.random.uniform(kw, (output_dim, input_dim),
                                minval=-bound, maxval=bound, dtype=jnp.float32)
    bias = jax.random.uniform(kb, (output_dim,),
                              minval=-bound, maxval=bound, dtype=jnp.float32)

    out = linear_forward(x, weight, bias)
    jax.block_until_ready(out)

    ref = x @ weight.T + bias
    assert out.shape == (batch, output_dim)
    assert jnp.allclose(out, ref, atol=1e-5, rtol=1e-5)

    # Larger, unaligned shapes exercise the tiling / padding / reduction paths.
    B2, K2, N2 = 300, 1000, 520
    kx2, kw2, kb2 = jax.random.split(jax.random.PRNGKey(1), 3)
    x2 = jax.random.normal(kx2, (B2, K2), dtype=jnp.float32)
    w2 = jax.random.normal(kw2, (N2, K2), dtype=jnp.float32) * 0.01
    b2 = jax.random.normal(kb2, (N2,), dtype=jnp.float32)
    out2 = linear_forward(x2, w2, b2)
    jax.block_until_ready(out2)
    ref2 = x2 @ w2.T + b2
    assert jnp.allclose(out2, ref2, atol=1e-3, rtol=1e-3)

    print("KERNEL_OK")
</pallas_src>

<mosaic_0001>
module attributes {stable_mosaic.version = 11 : i64} {
  func.func @_linear_kernel(%arg0: i32, %arg1: i32, %arg2: i32, %arg3: memref<8x128xf32, #tpu.memory_space<vmem>>, %arg4: memref<128x128xf32, #tpu.memory_space<vmem>>, %arg5: memref<1x128xf32, #tpu.memory_space<vmem>>, %arg6: memref<8x128xf32, #tpu.memory_space<vmem>>) attributes {dimension_semantics = [#tpu.dimension_semantics<parallel>, #tpu.dimension_semantics<parallel>, #tpu.dimension_semantics<arbitrary>], iteration_bounds = array<i64: 1, 1, 1>, scalar_prefetch = 0 : i64, scratch_operands = 0 : i64, tpu.core_type = #tpu.core_type<tc>, window_params = [{transform_indices = @transform_0, window_bounds = array<i64: 8, 128>}, {transform_indices = @transform_1, window_bounds = array<i64: 128, 128>}, {transform_indices = @transform_2, window_bounds = array<i64: 1, 128>}, {transform_indices = @transform_3, window_bounds = array<i64: 8, 128>}]} {
    %c0 = arith.constant 0 : index
    %c0_0 = arith.constant 0 : index
    %0 = vector.load %arg3[%c0, %c0_0] : memref<8x128xf32, #tpu.memory_space<vmem>>, vector<8x128xf32>
    %c0_1 = arith.constant 0 : index
    %c0_2 = arith.constant 0 : index
    %1 = vector.load %arg4[%c0_1, %c0_2] : memref<128x128xf32, #tpu.memory_space<vmem>>, vector<128x128xf32>
    %cst = arith.constant dense<0.000000e+00> : vector<8x128xf32>
    %2 = tpu.matmul %0, %1, %cst {dimension_numbers = #tpu.dot_dimension_numbers<[1], [0], [0], [1], [0, 0, 1, 1], [], []>} : vector<8x128xf32>, vector<128x128xf32>, vector<8x128xf32> -> vector<8x128xf32>
    %c0_i32 = arith.constant 0 : i32
    %3 = arith.cmpi eq, %arg2, %c0_i32 : i32
    %4 = arith.extui %3 : i1 to i32
    %c0_i32_3 = arith.constant 0 : i32
    %5 = arith.cmpi ne, %4, %c0_i32_3 : i32
    scf.if %5 {
      %c0_8 = arith.constant 0 : index
      %c0_9 = arith.constant 0 : index
      %12 = vector.load %arg6[%c0_8, %c0_9] : memref<8x128xf32, #tpu.memory_space<vmem>>, vector<8x128xf32>
      tpu.vector_store %arg6[%c0_8, %c0_9], %2 {strides = array<i32>} : memref<8x128xf32, #tpu.memory_space<vmem>>, vector<8x128xf32>,
    } else {
    }
    %c0_i32_4 = arith.constant 0 : i32
    %6 = arith.cmpi ne, %arg2, %c0_i32_4 : i32
    %7 = arith.extui %6 : i1 to i32
    %c0_i32_5 = arith.constant 0 : i32
    %8 = arith.cmpi ne, %7, %c0_i32_5 : i32
    scf.if %8 {
      %c0_8 = arith.constant 0 : index
      %c0_9 = arith.constant 0 : index
      %12 = vector.load %arg6[%c0_8, %c0_9] : memref<8x128xf32, #tpu.memory_space<vmem>>, vector<8x128xf32>
      %13 = arith.addf %12, %2 : vector<8x128xf32>
      %c0_10 = arith.constant 0 : index
      %c0_11 = arith.constant 0 : index
      %14 = vector.load %arg6[%c0_10, %c0_11] : memref<8x128xf32, #tpu.memory_space<vmem>>, vector<8x128xf32>
      tpu.vector_store %arg6[%c0_10, %c0_11], %13 {strides = array<i32>} : memref<8x128xf32, #tpu.memory_space<vmem>>, vector<8x128xf32>,
    } else {
    }
    %c0_i32_6 = arith.constant 0 : i32
    %9 = arith.cmpi eq, %arg2, %c0_i32_6 : i32
    %10 = arith.extui %9 : i1 to i32
    %c0_i32_7 = arith.constant 0 : i32
    %11 = arith.cmpi ne, %10, %c0_i32_7 : i32
    scf.if %11 {
      %c0_8 = arith.constant 0 : index
      %c0_9 = arith.constant 0 : index
      %12 = vector.load %arg6[%c0_8, %c0_9] : memref<8x128xf32, #tpu.memory_space<vmem>>, vector<8x128xf32>
      %c0_10 = arith.constant 0 : index
      %c0_11 = arith.constant 0 : index
      %13 = vector.load %arg5[%c0_10, %c0_11] : memref<1x128xf32, #tpu.memory_space<vmem>>, vector<1x128xf32>
      %14 = vector.broadcast %13 : vector<1x128xf32> to vector<8x128xf32>
      %15 = arith.addf %12, %14 : vector<8x128xf32>
      %c0_12 = arith.constant 0 : index
      %c0_13 = arith.constant 0 : index
      %16 = vector.load %arg6[%c0_12, %c0_13] : memref<8x128xf32, #tpu.memory_space<vmem>>, vector<8x128xf32>
      tpu.vector_store %arg6[%c0_12, %c0_13], %15 {strides = array<i32>} : memref<8x128xf32, #tpu.memory_space<vmem>>, vector<8x128xf32>,
    } else {
    }
    return
  }
  func.func @transform_0(%arg0: i32, %arg1: i32, %arg2: i32) -> (i32, i32) {
    %c0_i32 = arith.constant 0 : i32
    return %arg0, %arg2 : i32, i32
  }
  func.func @transform_1(%arg0: i32, %arg1: i32, %arg2: i32) -> (i32, i32) {
    %c0_i32 = arith.constant 0 : i32
    return %arg2, %arg1 : i32, i32
  }
  func.func @transform_2(%arg0: i32, %arg1: i32, %arg2: i32) -> (i32, i32) {
    %c0_i32 = arith.constant 0 : i32
    %c0_i32_0 = arith.constant 0 : i32
    return %c0_i32, %arg1 : i32, i32
  }
  func.func @transform_3(%arg0: i32, %arg1: i32, %arg2: i32) -> (i32, i32) {
    %c0_i32 = arith.constant 0 : i32
    return %arg0, %arg1 : i32, i32
  }
}

</mosaic_0001>

<bundles_post_ra>
// kernel: tpu_custom_call.1
= control target key start
LH: loop header
LB: loop body
LE: loop exit
PB: predicated region body
PF: predicated region fallthrough
CT: control target
= control target key end

     0   :  { %8 = vsyncpa [#allocation3], 0  ;;  %s243_s0 = inlined_call_operand.hbm [shape: f32[8,128], index: 0, kind: input, shape index: {}]   ;;  %s244_s1 = inlined_call_operand.hbm [shape: f32[128,128], index: 1, kind: input, shape index: {}]   ;;  %s245_s2 = inlined_call_operand.vmem [shape: f32[1,128], index: 2, kind: input, shape index: {}]   ;;  %s246_s3 = inlined_call_operand.hbm [shape: f32[8,128], index: 3, kind: output, shape index: {}]  }
   0x1   :  { %9 = vsyncpa [#allocation6], 0 }
   0x2   :  { %10 = vsyncpa [#allocation4], 0  ;;  %s16_s14 = sshll.u32 %s243_s0, 4  ;;  %s206_s15 = smov [#allocation2]   ;;  %s17_s14 = int_to_ptr.hbm [resolvable:$true] %s16_s14 }
   0x3   :  { %s18_s16 = sshll.u32 %s206_s15, 4  ;;  %s26_s19 = sshll.u32 %s244_s1, 4  ;;  %s19_s16 = int_to_ptr.vmem [resolvable:$true] %s18_s16  ;;  %s27_s19 = int_to_ptr.hbm [resolvable:$true] %s26_s19 }
   0x4   :  { %21 = dma.hbm_to_vmem [thread:$0]  %s17_s14, 128, %s19_s16, [#allocation3]  }
   0x5   :  { %s207_s20 = smov [#allocation5]   ;;  %s208_s22 = smov 128  }
   0x6   :  { %s28_s21 = sshll.u32 %s207_s20, 4  ;;  %s209_s23 = smov 8   ;;  %s29_s21 = int_to_ptr.vmem [resolvable:$true] %s28_s21 }
   0x7   :  { %34 = dma.hbm_to_vmem [thread:$0]  %s27_s19, 2048, %s29_s21, [#allocation6], %s208_s22, %s208_s22, %s209_s23  }
   0x8   :  { %200 = dma.done.wait [#allocation3], 128  }
   0x9   :  { %201 = vsyncadd [#allocation3], 4294967168 }
   0xa   :  { %202 = dma.done.wait [#allocation6], 2048  }
   0xb   :  { %203 = vsyncadd [#allocation6], 4294965248  ;;  %v61_v0 = vld [vmem:[#allocation5 + $0x78] sm:$0xff]  ;;  %v60_v1 = vld [vmem:[#allocation5 + $0x70] sm:$0xff]  ;;  %s210_s24 = smov [#allocation7]   ;;  %s111_s28 = sshll.u32 %s246_s3, 4  ;;  %s112_s28 = int_to_ptr.hbm [resolvable:$true] %s111_s28 }
   0xc   :  { %62 = vmatpush.msra.mxu0 %v61_v0  ;;  %v59_v2 = vld [vmem:[#allocation5 + $0x68] sm:$0xff]  ;;  %v58_v3 = vld [vmem:[#allocation5 + $0x60] sm:$0xff]  ;;  %v57_v4 = vld [vmem:[#allocation5 + $0x58] sm:$0xff]  ;;  %s109_s25 = sshll.u32 %s210_s24, 4  ;;  %s110_s25 = int_to_ptr.vmem [resolvable:$true] %s109_s25 }
   0xd   :  { %v56_v5 = vld [vmem:[#allocation5 + $0x50] sm:$0xff]  ;;  %v55_v6 = vld [vmem:[#allocation5 + $0x48] sm:$0xff]  ;;  %v54_v7 = vld [vmem:[#allocation5 + $0x40] sm:$0xff] }
   0xe   :  { %63 = vmatpush.msra.mxu0 %v60_v1  ;;  %v53_v8 = vld [vmem:[#allocation5 + $0x38] sm:$0xff]  ;;  %v52_v9 = vld [vmem:[#allocation5 + $0x30] sm:$0xff]  ;;  %v51_v10 = vld [vmem:[#allocation5 + $0x28] sm:$0xff] }
   0xf   :  { %v50_v11 = vld [vmem:[#allocation5 + $0x20] sm:$0xff]  ;;  %v49_v12 = vld [vmem:[#allocation5 + $0x18] sm:$0xff]  ;;  %v48_v13 = vld [vmem:[#allocation5 + $0x10] sm:$0xff] }
  0x10   :  { %64 = vmatpush.msra.mxu0 %v59_v2  ;;  %v47_v14 = vld [vmem:[#allocation5 + $0x8] sm:$0xff]  ;;  %v46_v15 = vld [vmem:[#allocation5] sm:$0xff]  ;;  %v45_v16 = vld [vmem:[#allocation2] sm:$0xff] }
  0x11   :  { %v127_v17 = vld [vmem:[%s245_s2] ss:$0 sm:$0xff] }
  0x12   :  { %65 = vmatpush.msra.mxu0 %v58_v3 }
  0x14   :  { %66 = vmatpush.msra.mxu0 %v57_v4 }
  0x16   :  { %67 = vmatpush.msra.mxu0 %v56_v5 }
  0x18   :  { %68 = vmatpush.msra.mxu0 %v55_v6 }
  0x1a   :  { %69 = vmatpush.msra.mxu0 %v54_v7 }
  0x1c   :  { %70 = vmatpush.msra.mxu0 %v53_v8 }
  0x1e   :  { %71 = vmatpush.msra.mxu0 %v52_v9 }
  0x20   :  { %72 = vmatpush.msra.mxu0 %v51_v10 }
  0x22   :  { %73 = vmatpush.msra.mxu0 %v50_v11 }
  0x24   :  { %74 = vmatpush.msra.mxu0 %v49_v12 }
  0x26   :  { %75 = vmatpush.msra.mxu0 %v48_v13 }
  0x28   :  { %76 = vmatpush.msra.mxu0 %v47_v14 }
  0x2a   :  { %77 = vmatpush.msra.mxu0 %v46_v15 }
  0x2b   :  { %78 = vmatmul.f32.vlgmr.msra.gmra.mxu0 %v45_v16 }
  0xa8   :  { %v79_v18 = vpop.f32.mrf.mxu0 }
  0xa9   :  { %v102_v19 = vadd.f32 %v127_v17, %v79_v18 }
  0xab   :  { %103 = vst [vmem:[#allocation7] sm:$0xff] %v102_v19 }
  0xac   :  { %114 = dma.vmem_to_hbm [thread:$0]  %s110_s25, 128, %s112_s28, [#allocation4]  }
  0xad   :  { %204 = dma.done.wait [#allocation4], 128  }
  0xae   :  { %205 = vsyncadd [#allocation4], 4294967168 }
  0xaf   :  { %119 = vsyncpa [#allocation3], 1 }
  0xb0   :  { %120 = vsyncpa [#allocation6], 1 }
  0xb1   :  { %121 = vsyncpa [#allocation4], 1 }

</bundles_post_ra>
